<compile_context>
chip_gen: v5e
topology: v5e:2x2
jax: 0.10.0
libtpu: 0.0.40
codegen_flags: <defaults>
</compile_context>

<pallas_src>
import numpy as np
import jax
import jax.numpy as jnp
from jax.experimental import pallas as pl
from jax.experimental.pallas import tpu as pltpu

EPS = 1e-5
NEG_SLOPE = 0.2
H1, H2 = 128, 256
TK_MAX = 4096          # largest layer-1 K tile; D <= TK_MAX => single grid step


def _bn_lrelu(h, gamma, beta):
    # BatchNorm1d (training mode: biased batch variance) + LeakyReLU(0.2), f32.
    mean = jnp.mean(h, axis=0, keepdims=True)
    var = jnp.mean((h - mean) ** 2, axis=0, keepdims=True)
    hn = gamma * (h - mean) * jax.lax.rsqrt(var + EPS) + beta
    return jnp.where(hn >= 0, hn, NEG_SLOPE * hn)


def _k_tiling(D, tk_max=TK_MAX):
    """Return (tk, num_k, Kp). Single full-width step for small D."""
    if D <= tk_max:
        return D, 1, D
    num_k = int(pl.cdiv(D, tk_max))
    return tk_max, num_k, num_k * tk_max


def _vmem_limit_bytes():
    # Generation-aware VMEM budget: ~3/4 of physical, capped at 96 MiB
    # (v5e/v6e: 128 MiB physical -> 96 MiB; v7x: 64 MiB physical -> 48 MiB).
    try:
        phys = pltpu.get_tpu_info().vmem_capacity_bytes
        return int(min(phys * 3 // 4, 96 * 1024 * 1024))
    except Exception:
        return 48 * 1024 * 1024   # safe everywhere (v7x has only 64 MiB physical)


def _make_kernel(D, tk, mask_tail):
    def kernel(x_ref, w1_ref, g1_ref, be1_ref,
               w2_ref, g2_ref, be2_ref,
               w3r_ref, b3_ref,
               out_ref, acc_ref):
        k = pl.program_id(0)

        @pl.when(k == 0)
        def _():
            acc_ref[...] = jnp.zeros_like(acc_ref)

        # Layer-1 partial matmul over this K tile. x arrives as f32 and is cast
        # to bf16 here (no wrapper-side cast pass over the full x array).
        x_tile = x_ref[...]                                        # (B, tk) f32
        if mask_tail:
            # Ragged last tile: zero columns beyond D (w1 tail rows are also
            # zero-padded at prep time, so the contribution is exactly 0).
            col = jax.lax.broadcasted_iota(jnp.int32, x_tile.shape, 1) + k * tk
            x_tile = jnp.where(col < D, x_tile, 0.0)
        acc_ref[...] += jnp.dot(x_tile.astype(jnp.bfloat16), w1_ref[...],
                                preferred_element_type=jnp.float32)

        @pl.when(k == pl.num_programs(0) - 1)
        def _():
            # Bias b1/b2 omitted: exact no-op before training-mode BatchNorm.
            h1 = _bn_lrelu(acc_ref[...], g1_ref[...], be1_ref[...])   # (B,128) f32
            h2 = jnp.dot(h1.astype(jnp.bfloat16), w2_ref[...],
                         preferred_element_type=jnp.float32)          # (B,256) f32
            h2 = _bn_lrelu(h2, g2_ref[...], be2_ref[...])
            # 256 -> 1 projection as a lane reduction (XLU), not an N=1 MXU push.
            logit = jnp.sum(h2 * w3r_ref[...], axis=-1, keepdims=True) + b3_ref[...]
            out_ref[...] = jax.nn.sigmoid(logit)                      # (B,1)
    return kernel


def init_params(key, in_features):
    """Deterministic init mimicking PyTorch nn.Linear defaults (f32 'module' params)."""
    dims = [(in_features, H1), (128, H2), (256, 1)]
    params = {}
    for li, (fan_in, fan_out) in enumerate(dims, start=1):
        key, kw, kb = jax.random.split(key, 3)
        bound = 1.0 / np.sqrt(fan_in)
        params[f"w{li}"] = jax.random.uniform(
            kw, (fan_in, fan_out), jnp.float32, -bound, bound)
        params[f"b{li}"] = jax.random.uniform(
            kb, (1, fan_out), jnp.float32, -bound, bound)
    # b1/b2 are kept only for the f32 reference (cancelled by training-mode BN).
    params["g1"] = jnp.ones((1, H1), jnp.float32)
    params["be1"] = jnp.zeros((1, H1), jnp.float32)
    params["g2"] = jnp.ones((1, H2), jnp.float32)
    params["be2"] = jnp.zeros((1, H2), jnp.float32)
    return params


def prepare_params(params, *, tk_max=TK_MAX):
    """One-time (per parameter update) kernel-side preparation:
    bf16 cast of w1/w2 and zero-padding of w1 up to the K-tile boundary."""
    D = params["w1"].shape[0]
    tk, num_k, Kp = _k_tiling(D, tk_max)
    w1 = params["w1"].astype(jnp.bfloat16)
    if Kp != D:
        w1 = jnp.pad(w1, ((0, Kp - D), (0, 0)))
    return {
        "w1": w1,                                   # (Kp, 128) bf16
        "w2": params["w2"].astype(jnp.bfloat16),    # (128, 256) bf16
        "g1": params["g1"], "be1": params["be1"],
        "g2": params["g2"], "be2": params["be2"],
        "w3r": params["w3"].reshape(1, H2),         # row layout for lane reduce
        "b3": params["b3"].reshape(1, 1),
        "tk": tk, "num_k": num_k, "D": D,
    }


def discriminator_forward(audio, prep):
    B = audio.shape[0]
    x = audio.reshape(B, -1).astype(jnp.float32)     # == audio.view(B, -1); stays f32
    D = x.shape[1]
    assert D == prep["D"], "prepared params do not match input feature count"

    tk, num_k = prep["tk"], prep["num_k"]
    Kp = num_k * tk
    mask_tail = (Kp != D)

    flops = 2 * B * (D * H1 + H1 * H2 + H2)
    bytes_accessed = (B * D * 4 + Kp * H1 * 2 + H1 * H2 * 2
                      + (2 * (H1 + H2) + H2 + 1 + B) * 4)
    cost = pl.CostEstimate(flops=flops,
                           transcendentals=B + H1 + H2,
                           bytes_accessed=int(bytes_accessed))

    grid_spec = pltpu.PrefetchScalarGridSpec(
        num_scalar_prefetch=0,
        grid=(num_k,),
        in_specs=[
            pl.BlockSpec((B, tk), lambda k: (0, k)),      # x K-tile (f32)
            pl.BlockSpec((tk, H1), lambda k: (k, 0)),     # w1 K-tile (bf16)
            pl.BlockSpec((1, H1), lambda k: (0, 0)),      # gamma1
            pl.BlockSpec((1, H1), lambda k: (0, 0)),      # beta1
            pl.BlockSpec((H1, H2), lambda k: (0, 0)),     # w2 (resident, bf16)
            pl.BlockSpec((1, H2), lambda k: (0, 0)),      # gamma2
            pl.BlockSpec((1, H2), lambda k: (0, 0)),      # beta2
            pl.BlockSpec((1, H2), lambda k: (0, 0)),      # w3 row
            pl.BlockSpec((1, 1), lambda k: (0, 0)),       # b3
        ],
        out_specs=pl.BlockSpec((B, 1), lambda k: (0, 0)),
        scratch_shapes=[pltpu.VMEM((B, H1), jnp.float32)],
    )

    return pl.pallas_call(
        _make_kernel(D, tk, mask_tail),
        out_shape=jax.ShapeDtypeStruct((B, 1), jnp.float32),
        grid_spec=grid_spec,
        compiler_params=pltpu.CompilerParams(
            dimension_semantics=("arbitrary",),
            vmem_limit_bytes=_vmem_limit_bytes()),
        cost_estimate=cost,
    )(x, prep["w1"], prep["g1"], prep["be1"],
      prep["w2"], prep["g2"], prep["be2"], prep["w3r"], prep["b3"])


def _reference_forward(audio, params):
    """Pure-JAX f32 reference matching the PyTorch module forward (training-mode BN)."""
    B = audio.shape[0]
    x = audio.reshape(B, -1).astype(jnp.float32)
    h1 = x @ params["w1"] + params["b1"]
    h1 = _bn_lrelu(h1, params["g1"], params["be1"])
    h2 = h1 @ params["w2"] + params["b2"]
    h2 = _bn_lrelu(h2, params["g2"], params["be2"])
    logit = h2 @ params["w3"] + params["b3"]
    return jax.nn.sigmoid(logit)


if __name__ == "__main__":
    key = jax.random.PRNGKey(0)
    k_data, k_params = jax.random.split(key)

    input_shape = (4, 16, 16)                     # (C, H, W) -> D = 1024
    batch = 2
    audio = jax.random.normal(k_data, (batch,) + input_shape, jnp.float32)

    params = init_params(k_params, int(np.prod(input_shape)))
    prep = prepare_params(params)                 # one-time bf16 cast + K padding

    validity = discriminator_forward(audio, prep)
    validity = jax.block_until_ready(validity)

    assert validity.shape == (batch, 1)
    assert bool(jnp.all(jnp.isfinite(validity)))
    assert bool(jnp.all((validity >= 0.0) & (validity <= 1.0)))

    # Numerical check vs f32 reference (bf16 matmul operands => loose tolerance).
    ref = _reference_forward(audio, params)
    assert bool(jnp.allclose(validity, ref, atol=5e-2)), (validity, ref)

    print("KERNEL_OK")
</pallas_src>

<mosaic_0001>
module attributes {stable_mosaic.version = 11 : i64} {
  func.func @kernel(%arg0: i32, %arg1: memref<2x1024xf32, #tpu.memory_space<vmem>>, %arg2: memref<1024x128xbf16, #tpu.memory_space<vmem>>, %arg3: memref<1x128xf32, #tpu.memory_space<vmem>>, %arg4: memref<1x128xf32, #tpu.memory_space<vmem>>, %arg5: memref<128x256xbf16, #tpu.memory_space<vmem>>, %arg6: memref<1x256xf32, #tpu.memory_space<vmem>>, %arg7: memref<1x256xf32, #tpu.memory_space<vmem>>, %arg8: memref<1x256xf32, #tpu.memory_space<vmem>>, %arg9: memref<1x1xf32, #tpu.memory_space<vmem>>, %arg10: memref<2x1xf32, #tpu.memory_space<vmem>>, %arg11: memref<2x128xf32, #tpu.memory_space<vmem>>) attributes {dimension_semantics = [#tpu.dimension_semantics<arbitrary>], iteration_bounds = array<i64: 1>, scalar_prefetch = 0 : i64, scratch_operands = 1 : i64, tpu.core_type = #tpu.core_type<tc>, window_params = [{transform_indices = @transform_0, window_bounds = array<i64: 2, 1024>}, {transform_indices = @transform_1, window_bounds = array<i64: 1024, 128>}, {pipeline_mode = #tpu.pipeline_mode<synchronous>, transform_indices = @transform_2, window_bounds = array<i64: 1, 128>}, {pipeline_mode = #tpu.pipeline_mode<synchronous>, transform_indices = @transform_3, window_bounds = array<i64: 1, 128>}, {pipeline_mode = #tpu.pipeline_mode<synchronous>, transform_indices = @transform_4, window_bounds = array<i64: 128, 256>}, {pipeline_mode = #tpu.pipeline_mode<synchronous>, transform_indices = @transform_5, window_bounds = array<i64: 1, 256>}, {pipeline_mode = #tpu.pipeline_mode<synchronous>, transform_indices = @transform_6, window_bounds = array<i64: 1, 256>}, {pipeline_mode = #tpu.pipeline_mode<synchronous>, transform_indices = @transform_7, window_bounds = array<i64: 1, 256>}, {pipeline_mode = #tpu.pipeline_mode<synchronous>, transform_indices = @transform_8, window_bounds = array<i64: 1, 1>}, {pipeline_mode = #tpu.pipeline_mode<synchronous>, transform_indices = @transform_9, window_bounds = array<i64: 2, 1>}]} {
    %c0_i32 = arith.constant 0 : i32
    %0 = arith.cmpi eq, %arg0, %c0_i32 : i32
    %1 = arith.extui %0 : i1 to i32
    %c0_i32_0 = arith.constant 0 : i32
    %2 = arith.cmpi ne, %1, %c0_i32_0 : i32
    scf.if %2 {
      %cst_10 = arith.constant 0.000000e+00 : f32
      %13 = vector.broadcast %cst_10 : f32 to vector<2x128xf32>
      %c0_11 = arith.constant 0 : index
      %c0_12 = arith.constant 0 : index
      %14 = vector.load %arg11[%c0_11, %c0_12] : memref<2x128xf32, #tpu.memory_space<vmem>>, vector<2x128xf32>
      tpu.vector_store %arg11[%c0_11, %c0_12], %13 {strides = array<i32>} : memref<2x128xf32, #tpu.memory_space<vmem>>, vector<2x128xf32>,
    } else {
    }
    %c0 = arith.constant 0 : index
    %c0_1 = arith.constant 0 : index
    %3 = vector.load %arg1[%c0, %c0_1] : memref<2x1024xf32, #tpu.memory_space<vmem>>, vector<2x1024xf32>
    %c0_2 = arith.constant 0 : index
    %c0_3 = arith.constant 0 : index
    %4 = vector.load %arg11[%c0_2, %c0_3] : memref<2x128xf32, #tpu.memory_space<vmem>>, vector<2x128xf32>
    %5 = arith.truncf %3 : vector<2x1024xf32> to vector<2x1024xbf16>
    %c0_4 = arith.constant 0 : index
    %c0_5 = arith.constant 0 : index
    %6 = vector.load %arg2[%c0_4, %c0_5] : memref<1024x128xbf16, #tpu.memory_space<vmem>>, vector<1024x128xbf16>
    %cst = arith.constant dense<0.000000e+00> : vector<2x128xf32>
    %7 = tpu.matmul %5, %6, %cst {dimension_numbers = #tpu.dot_dimension_numbers<[1], [0], [0], [1], [0, 0, 1, 1], [], []>} : vector<2x1024xbf16>, vector<1024x128xbf16>, vector<2x128xf32> -> vector<2x128xf32>
    %8 = arith.addf %4, %7 : vector<2x128xf32>
    %c0_6 = arith.constant 0 : index
    %c0_7 = arith.constant 0 : index
    %9 = vector.load %arg11[%c0_6, %c0_7] : memref<2x128xf32, #tpu.memory_space<vmem>>, vector<2x128xf32>
    tpu.vector_store %arg11[%c0_6, %c0_7], %8 {strides = array<i32>} : memref<2x128xf32, #tpu.memory_space<vmem>>, vector<2x128xf32>,
    %c0_i32_8 = arith.constant 0 : i32
    %10 = arith.cmpi eq, %arg0, %c0_i32_8 : i32
    %11 = arith.extui %10 : i1 to i32
    %c0_i32_9 = arith.constant 0 : i32
    %12 = arith.cmpi ne, %11, %c0_i32_9 : i32
    scf.if %12 {
      %c0_10 = arith.constant 0 : index
      %c0_11 = arith.constant 0 : index
      %13 = vector.load %arg11[%c0_10, %c0_11] : memref<2x128xf32, #tpu.memory_space<vmem>>, vector<2x128xf32>
      %c0_12 = arith.constant 0 : index
      %c0_13 = arith.constant 0 : index
      %14 = vector.load %arg3[%c0_12, %c0_13] : memref<1x128xf32, #tpu.memory_space<vmem>>, vector<1x128xf32>
      %c0_14 = arith.constant 0 : index
      %c0_15 = arith.constant 0 : index
      %15 = vector.load %arg4[%c0_14, %c0_15] : memref<1x128xf32, #tpu.memory_space<vmem>>, vector<1x128xf32>
      %cst_16 = arith.constant dense<0.000000e+00> : vector<128xf32>
      %16 = vector.multi_reduction <add>, %13, %cst_16 [0] : vector<2x128xf32> to vector<128xf32>
      %17 = vector.shape_cast %16 : vector<128xf32> to vector<1x128xf32>
      %cst_17 = arith.constant 2.000000e+00 : f32
      %18 = vector.broadcast %cst_17 : f32 to vector<1x128xf32>
      %19 = arith.divf %17, %18 : vector<1x128xf32>
      %20 = vector.broadcast %19 : vector<1x128xf32> to vector<2x128xf32>
      %21 = arith.subf %13, %20 : vector<2x128xf32>
      %22 = arith.mulf %21, %21 : vector<2x128xf32>
      %cst_18 = arith.constant dense<0.000000e+00> : vector<128xf32>
      %23 = vector.multi_reduction <add>, %22, %cst_18 [0] : vector<2x128xf32> to vector<128xf32>
      %24 = vector.shape_cast %23 : vector<128xf32> to vector<1x128xf32>
      %cst_19 = arith.constant 2.000000e+00 : f32
      %25 = vector.broadcast %cst_19 : f32 to vector<1x128xf32>
      %26 = arith.divf %24, %25 : vector<1x128xf32>
      %27 = vector.broadcast %19 : vector<1x128xf32> to vector<2x128xf32>
      %28 = arith.subf %13, %27 : vector<2x128xf32>
      %29 = vector.broadcast %14 : vector<1x128xf32> to vector<2x128xf32>
      %30 = arith.mulf %29, %28 : vector<2x128xf32>
      %cst_20 = arith.constant 9.99999974E-6 : f32
      %31 = vector.broadcast %cst_20 : f32 to vector<1x128xf32>
      %32 = arith.addf %26, %31 : vector<1x128xf32>
      %33 = math.rsqrt %32 : vector<1x128xf32>
      %34 = vector.broadcast %33 : vector<1x128xf32> to vector<2x128xf32>
      %35 = arith.mulf %30, %34 : vector<2x128xf32>
      %36 = vector.broadcast %15 : vector<1x128xf32> to vector<2x128xf32>
      %37 = arith.addf %35, %36 : vector<2x128xf32>
      %cst_21 = arith.constant 0.000000e+00 : f32
      %38 = vector.broadcast %cst_21 : f32 to vector<2x128xf32>
      %39 = arith.cmpf oge, %37, %38 : vector<2x128xf32>
      %cst_22 = arith.constant 2.000000e-01 : f32
      %40 = vector.broadcast %cst_22 : f32 to vector<2x128xf32>
      %41 = arith.mulf %40, %37 : vector<2x128xf32>
      %42 = arith.select %39, %37, %41 : vector<2x128xi1>, vector<2x128xf32>
      %43 = arith.truncf %42 : vector<2x128xf32> to vector<2x128xbf16>
      %c0_23 = arith.constant 0 : index
      %c0_24 = arith.constant 0 : index
      %44 = vector.load %arg5[%c0_23, %c0_24] : memref<128x256xbf16, #tpu.memory_space<vmem>>, vector<128x256xbf16>
      %cst_25 = arith.constant dense<0.000000e+00> : vector<2x256xf32>
      %45 = tpu.matmul %43, %44, %cst_25 {dimension_numbers = #tpu.dot_dimension_numbers<[1], [0], [0], [1], [0, 0, 1, 1], [], []>} : vector<2x128xbf16>, vector<128x256xbf16>, vector<2x256xf32> -> vector<2x256xf32>
      %c0_26 = arith.constant 0 : index
      %c0_27 = arith.constant 0 : index
      %46 = vector.load %arg6[%c0_26, %c0_27] : memref<1x256xf32, #tpu.memory_space<vmem>>, vector<1x256xf32>
      %c0_28 = arith.constant 0 : index
      %c0_29 = arith.constant 0 : index
      %47 = vector.load %arg7[%c0_28, %c0_29] : memref<1x256xf32, #tpu.memory_space<vmem>>, vector<1x256xf32>
      %cst_30 = arith.constant dense<0.000000e+00> : vector<256xf32>
      %48 = vector.multi_reduction <add>, %45, %cst_30 [0] : vector<2x256xf32> to vector<256xf32>
      %49 = vector.shape_cast %48 : vector<256xf32> to vector<1x256xf32>
      %cst_31 = arith.constant 2.000000e+00 : f32
      %50 = vector.broadcast %cst_31 : f32 to vector<1x256xf32>
      %51 = arith.divf %49, %50 : vector<1x256xf32>
      %52 = vector.broadcast %51 : vector<1x256xf32> to vector<2x256xf32>
      %53 = arith.subf %45, %52 : vector<2x256xf32>
      %54 = arith.mulf %53, %53 : vector<2x256xf32>
      %cst_32 = arith.constant dense<0.000000e+00> : vector<256xf32>
      %55 = vector.multi_reduction <add>, %54, %cst_32 [0] : vector<2x256xf32> to vector<256xf32>
      %56 = vector.shape_cast %55 : vector<256xf32> to vector<1x256xf32>
      %cst_33 = arith.constant 2.000000e+00 : f32
      %57 = vector.broadcast %cst_33 : f32 to vector<1x256xf32>
      %58 = arith.divf %56, %57 : vector<1x256xf32>
      %59 = vector.broadcast %51 : vector<1x256xf32> to vector<2x256xf32>
      %60 = arith.subf %45, %59 : vector<2x256xf32>
      %61 = vector.broadcast %46 : vector<1x256xf32> to vector<2x256xf32>
      %62 = arith.mulf %61, %60 : vector<2x256xf32>
      %cst_34 = arith.constant 9.99999974E-6 : f32
      %63 = vector.broadcast %cst_34 : f32 to vector<1x256xf32>
      %64 = arith.addf %58, %63 : vector<1x256xf32>
      %65 = math.rsqrt %64 : vector<1x256xf32>
      %66 = vector.broadcast %65 : vector<1x256xf32> to vector<2x256xf32>
      %67 = arith.mulf %62, %66 : vector<2x256xf32>
      %68 = vector.broadcast %47 : vector<1x256xf32> to vector<2x256xf32>
      %69 = arith.addf %67, %68 : vector<2x256xf32>
      %cst_35 = arith.constant 0.000000e+00 : f32
      %70 = vector.broadcast %cst_35 : f32 to vector<2x256xf32>
      %71 = arith.cmpf oge, %69, %70 : vector<2x256xf32>
      %cst_36 = arith.constant 2.000000e-01 : f32
      %72 = vector.broadcast %cst_36 : f32 to vector<2x256xf32>
      %73 = arith.mulf %72, %69 : vector<2x256xf32>
      %74 = arith.select %71, %69, %73 : vector<2x256xi1>, vector<2x256xf32>
      %c0_37 = arith.constant 0 : index
      %c0_38 = arith.constant 0 : index
      %75 = vector.load %arg8[%c0_37, %c0_38] : memref<1x256xf32, #tpu.memory_space<vmem>>, vector<1x256xf32>
      %76 = vector.broadcast %75 : vector<1x256xf32> to vector<2x256xf32>
      %77 = arith.mulf %74, %76 : vector<2x256xf32>
      %cst_39 = arith.constant dense<0.000000e+00> : vector<2xf32>
      %78 = vector.multi_reduction <add>, %77, %cst_39 [1] : vector<2x256xf32> to vector<2xf32>
      %79 = vector.shape_cast %78 : vector<2xf32> to vector<2x1xf32>
      %c0_40 = arith.constant 0 : index
      %c0_41 = arith.constant 0 : index
      %80 = vector.load %arg9[%c0_40, %c0_41] : memref<1x1xf32, #tpu.memory_space<vmem>>, vector<1x1xf32>
      %81 = vector.broadcast %80 : vector<1x1xf32> to vector<2x1xf32>
      %82 = arith.addf %79, %81 : vector<2x1xf32>
      %83 = arith.negf %82 : vector<2x1xf32>
      %84 = math.exp %83 : vector<2x1xf32>
      %cst_42 = arith.constant 1.000000e+00 : f32
      %85 = vector.broadcast %cst_42 : f32 to vector<2x1xf32>
      %86 = arith.addf %85, %84 : vector<2x1xf32>
      %87 = arith.divf %85, %86 : vector<2x1xf32>
      %c0_43 = arith.constant 0 : index
      %c0_44 = arith.constant 0 : index
      %88 = vector.load %arg10[%c0_43, %c0_44] : memref<2x1xf32, #tpu.memory_space<vmem>>, vector<2x1xf32>
      tpu.vector_store %arg10[%c0_43, %c0_44], %87 {strides = array<i32>} : memref<2x1xf32, #tpu.memory_space<vmem>>, vector<2x1xf32>,
    } else {
    }
    return
  }
  func.func @transform_0(%arg0: i32) -> (i32, i32) {
    %c0_i32 = arith.constant 0 : i32
    %c0_i32_0 = arith.constant 0 : i32
    return %c0_i32, %arg0 : i32, i32
  }
  func.func @transform_1(%arg0: i32) -> (i32, i32) {
    %c0_i32 = arith.constant 0 : i32
    %c0_i32_0 = arith.constant 0 : i32
    return %arg0, %c0_i32 : i32, i32
  }
  func.func @transform_2(%arg0: i32) -> (i32, i32) {
    %c0_i32 = arith.constant 0 : i32
    %c0_i32_0 = arith.constant 0 : i32
    %c0_i32_1 = arith.constant 0 : i32
    return %c0_i32, %c0_i32_0 : i32, i32
  }
  func.func @transform_3(%arg0: i32) -> (i32, i32) {
    %c0_i32 = arith.constant 0 : i32
    %c0_i32_0 = arith.constant 0 : i32
    %c0_i32_1 = arith.constant 0 : i32
    return %c0_i32, %c0_i32_0 : i32, i32
  }
  func.func @transform_4(%arg0: i32) -> (i32, i32) {
    %c0_i32 = arith.constant 0 : i32
    %c0_i32_0 = arith.constant 0 : i32
    %c0_i32_1 = arith.constant 0 : i32
    return %c0_i32, %c0_i32_0 : i32, i32
  }
  func.func @transform_5(%arg0: i32) -> (i32, i32) {
    %c0_i32 = arith.constant 0 : i32
    %c0_i32_0 = arith.constant 0 : i32
    %c0_i32_1 = arith.constant 0 : i32
    return %c0_i32, %c0_i32_0 : i32, i32
  }
  func.func @transform_6(%arg0: i32) -> (i32, i32) {
    %c0_i32 = arith.constant 0 : i32
    %c0_i32_0 = arith.constant 0 : i32
    %c0_i32_1 = arith.constant 0 : i32
    return %c0_i32, %c0_i32_0 : i32, i32
  }
  func.func @transform_7(%arg0: i32) -> (i32, i32) {
    %c0_i32 = arith.constant 0 : i32
    %c0_i32_0 = arith.constant 0 : i32
    %c0_i32_1 = arith.constant 0 : i32
    return %c0_i32, %c0_i32_0 : i32, i32
  }
  func.func @transform_8(%arg0: i32) -> (i32, i32) {
    %c0_i32 = arith.constant 0 : i32
    %c0_i32_0 = arith.constant 0 : i32
    %c0_i32_1 = arith.constant 0 : i32
    return %c0_i32, %c0_i32_0 : i32, i32
  }
  func.func @transform_9(%arg0: i32) -> (i32, i32) {
    %c0_i32 = arith.constant 0 : i32
    %c0_i32_0 = arith.constant 0 : i32
    %c0_i32_1 = arith.constant 0 : i32
    return %c0_i32, %c0_i32_0 : i32, i32
  }
}

</mosaic_0001>

<bundles_post_ra>
// kernel: tpu_custom_call.1
= control target key start
LH: loop header
LB: loop body
LE: loop exit
PB: predicated region body
PF: predicated region fallthrough
CT: control target
= control target key end

     0   :  { %s1727_s0 = inlined_call_operand.hbm [shape: f32[2,1024], index: 0, kind: input, shape index: {}]   ;;  %s1728_s1 = inlined_call_operand.hbm [shape: bf16[1024,128], index: 1, kind: input, shape index: {}]   ;;  %s1729_s2 = inlined_call_operand.hbm [shape: f32[1,128], index: 2, kind: input, shape index: {}]   ;;  %s1730_s3 = inlined_call_operand.hbm [shape: f32[1,128], index: 3, kind: input, shape index: {}]   ;;  %s1731_s4 = inlined_call_operand.hbm [shape: bf16[128,256], index: 4, kind: input, shape index: {}]   ;;  %s1732_s5 = inlined_call_operand.vmem [shape: f32[1,256], index: 5, kind: input, shape index: {}]   ;;  %s1733_s6 = inlined_call_operand.vmem [shape: f32[1,256], index: 6, kind: input, shape index: {}]   ;;  %s1734_s7 = inlined_call_operand.vmem [shape: f32[1,256], index: 7, kind: input, shape index: {}]   ;;  %s1735_s8 = inlined_call_operand.<no memory space> [shape: f32[1,1], index: 8, kind: input, shape index: {}]   ;;  %s1736_s9 = inlined_call_operand.vmem [shape: f32[2,1], index: 9, kind: output, shape index: {}]  }
   0x1   :  { %v14_v0 = vstv %s1735_s8 }
   0x2   :  { %15 = vst [vmem:[#allocation3] sm:$0x1] %v14_v0 }
   0x3   :  { %16 = vsyncpa [#allocation5], 0 }
   0x4   :  { %17 = vsyncpa [#allocation7], 0  ;;  %s34_s13 = sshll.u32 %s1728_s1, 4  ;;  %s35_s13 = int_to_ptr.hbm [resolvable:$true] %s34_s13 }
   0x5   :  { %18 = vsyncpa [#allocation10], 0  ;;  %s1620_s14 = smov [#allocation6]   ;;  %s59_s18 = sshll.u32 %s1730_s3, 4  ;;  %s60_s18 = int_to_ptr.hbm [resolvable:$true] %s59_s18 }
   0x6   :  { %s36_s15 = sshll.u32 %s1620_s14, 4  ;;  %s1621_s19 = smov 64   ;;  %s37_s15 = int_to_ptr.vmem [resolvable:$true] %s36_s15 }
   0x7   :  { %s1622_s20 = smov 4   ;;  %s1623_s8 = smov [#allocation9]  }
   0x8   :  { %42 = dma.hbm_to_vmem [thread:$0]  %s35_s13, 8192, %s37_s15, [#allocation7], %s1621_s19, %s1621_s19, %s1622_s20  }
   0x9   :  { %s61_s21 = sshll.u32 %s1623_s8, 4  ;;  %s24_s24 = sshll.u32 %s1727_s0, 4  ;;  %s62_s21 = int_to_ptr.vmem [resolvable:$true] %s61_s21  ;;  %s25_s24 = int_to_ptr.hbm [resolvable:$true] %s24_s24 }
   0xa   :  { %64 = dma.hbm_to_vmem [thread:$0]  %s60_s18, 16, %s62_s21, [#allocation10]  }
   0xb   :  { %s48_s26 = sshll.u32 %s1729_s2, 4  ;;  %s1624_s27 = smov [#allocation4]   ;;  %s49_s26 = int_to_ptr.hbm [resolvable:$true] %s48_s26 }
   0xc   :  { %s26_s28 = sshll.u32 %s1624_s27, 4  ;;  %s1625_s3 = smov [#allocation8]   ;;  %s27_s28 = int_to_ptr.vmem [resolvable:$true] %s26_s28 }
   0xd   :  { %29 = dma.hbm_to_vmem [thread:$0]  %s25_s24, 256, %s27_s28, [#allocation5]  }
   0xe   :  { %s50_s29 = sshll.u32 %s1625_s3, 4  ;;  %s69_s11 = sshll.u32 %s1731_s4, 4  ;;  %s51_s29 = int_to_ptr.vmem [resolvable:$true] %s50_s29  ;;  %s70_s11 = int_to_ptr.hbm [resolvable:$true] %s69_s11 }
   0xf   :  { %53 = dma.hbm_to_vmem [thread:$0]  %s49_s26, 16, %s51_s29, [#allocation7]  }
  0x10   :  { %s1626_s0 = smov [#allocation11]   ;;  %s1627_s13 = smov 128  }
  0x11   :  { %s71_s12 = sshll.u32 %s1626_s0, 4  ;;  %s1628_s14 = smov 8   ;;  %s72_s12 = int_to_ptr.vmem [resolvable:$true] %s71_s12 }
  0x12   :  { %77 = dma.hbm_to_vmem [thread:$0]  %s70_s11, 2048, %s72_s12, [#allocation10], %s1627_s13, %s1627_s13, %s1628_s14  }
  0x13   :  { %1614 = dma.done.wait [#allocation5], 256  }
  0x14   :  { %1615 = vsyncadd [#allocation5], 4294967040 }
  0x15   :  { %1616 = dma.done.wait [#allocation7], 8208  }
  0x16   :  { %1617 = vsyncadd [#allocation7], 4294959088 }
  0x17   :  { %1618 = dma.done.wait [#allocation10], 2064  }
  0x18   :  { %1619 = vsyncadd [#allocation10], 4294965232  ;;  %v1395_v1 = vld [vmem:[#allocation6 + $0x38] sm:$0xff]  ;;  %v1394_v5 = vld [vmem:[#allocation6 + $0x30] sm:$0xff]  ;;  %vm767_vm0 = vcmask 1041408  }
  0x19   :  { %v1403_v2 = vld [vmem:[#allocation6 + $0x78] sm:$0xff]  ;;  %655 = vmatpush.bf16.msra.mxu0 %v1395_v1  ;;  %v1402_v6 = vld [vmem:[#allocation6 + $0x70] sm:$0xff]  ;;  %v1393_v9 = vld [vmem:[#allocation6 + $0x28] sm:$0xff] }
  0x1a   :  { %v1411_v3 = vld [vmem:[#allocation6 + $0xb8] sm:$0xff]  ;;  %668 = vmatpush.bf16.msra.mxu1 %v1403_v2  ;;  %v1410_v7 = vld [vmem:[#allocation6 + $0xb0] sm:$0xff]  ;;  %v1401_v10 = vld [vmem:[#allocation6 + $0x68] sm:$0xff] }
  0x1b   :  { %v1419_v4 = vld [vmem:[#allocation6 + $0xf8] sm:$0xff]  ;;  %681 = vmatpush.bf16.msra.mxu2 %v1411_v3  ;;  %v1418_v8 = vld [vmem:[#allocation6 + $0xf0] sm:$0xff]  ;;  %v1409_v11 = vld [vmem:[#allocation6 + $0xa8] sm:$0xff] }
  0x1c   :  { %694 = vmatpush.bf16.msra.mxu3 %v1419_v4  ;;  %v1417_v12 = vld [vmem:[#allocation6 + $0xe8] sm:$0xff]  ;;  %v1392_v13 = vld [vmem:[#allocation6 + $0x20] sm:$0xff]  ;;  %v111_v17 = vld [vmem:[#allocation4] sm:$0xff] }
  0x1d   :  { %656 = vmatpush.bf16.msra.mxu0 %v1394_v5  ;;  %v1400_v14 = vld [vmem:[#allocation6 + $0x60] sm:$0xff]  ;;  %v1391_v18 = vld [vmem:[#allocation6 + $0x18] sm:$0xff]  ;;  %116 = vst [vmem:[#allocation1] ss:$4 sm:$0xff] %v111_v17  ;;  %v1390_v22 = vld [vmem:[#allocation6 + $0x10] sm:$0xff] }
  0x1e   :  { %669 = vmatpush.bf16.msra.mxu1 %v1402_v6  ;;  %v1408_v15 = vld [vmem:[#allocation6 + $0xa0] sm:$0xff]  ;;  %v1399_v19 = vld [vmem:[#allocation6 + $0x58] sm:$0xff]  ;;  %v1398_v23 = vld [vmem:[#allocation6 + $0x50] sm:$0xff] }
  0x1f   :  { %682 = vmatpush.bf16.msra.mxu2 %v1410_v7  ;;  %v1416_v16 = vld [vmem:[#allocation6 + $0xe0] sm:$0xff]  ;;  %v1407_v20 = vld [vmem:[#allocation6 + $0x98] sm:$0xff]  ;;  %v1406_v24 = vld [vmem:[#allocation6 + $0x90] sm:$0xff] }
  0x20   :  { %695 = vmatpush.bf16.msra.mxu3 %v1418_v8  ;;  %v1415_v21 = vld [vmem:[#allocation6 + $0xd8] sm:$0xff]  ;;  %v1414_v25 = vld [vmem:[#allocation6 + $0xd0] sm:$0xff]  ;;  %v1389_v26 = vld [vmem:[#allocation6 + $0x8] sm:$0xff] }
  0x21   :  { %657 = vmatpush.bf16.msra.mxu0 %v1393_v9  ;;  %v1397_v27 = vld [vmem:[#allocation6 + $0x48] sm:$0xff]  ;;  %v112_v30 = vld [vmem:[#allocation4 + $0x8] sm:$0xff]  ;;  %v1388_v31 = vld [vmem:[#allocation6] sm:$0xff] }
  0x22   :  { %670 = vmatpush.bf16.msra.mxu1 %v1401_v10  ;;  %v1405_v28 = vld [vmem:[#allocation6 + $0x88] sm:$0xff]  ;;  %v1396_v32 = vld [vmem:[#allocation6 + $0x40] sm:$0xff]  ;;  %118 = vst [vmem:[#allocation1 + $0x20] ss:$4 sm:$0xff] %v112_v30  ;;  %v1427_v35 = vld [vmem:[#allocation6 + $0x138] sm:$0xff] }
  0x23   :  { %683 = vmatpush.bf16.msra.mxu2 %v1409_v11  ;;  %v1413_v29 = vld [vmem:[#allocation6 + $0xc8] sm:$0xff]  ;;  %v1404_v33 = vld [vmem:[#allocation6 + $0x80] sm:$0xff]  ;;  %v1435_v36 = vld [vmem:[#allocation6 + $0x178] sm:$0xff] }
  0x24   :  { %696 = vmatpush.bf16.msra.mxu3 %v1417_v12  ;;  %v1412_v34 = vld [vmem:[#allocation6 + $0xc0] sm:$0xff]  ;;  %v121_v37 = vld.sshfl [vmem:[#allocation1 + $0x10] sm:$0xff pattern:$0x73625140]  ;;  %v1425_v51 = vld [vmem:[#allocation6 + $0x128] sm:$0xff] }
  0x25   :  { %658 = vmatpush.bf16.msra.mxu0 %v1392_v13  ;;  %v119_v38 = vld.sshfl [vmem:[#allocation1] sm:$0xff pattern:$0x73625140]  ;;  %v122_v39 = vld.sshfl [vmem:[#allocation1 + $0x18] sm:$0xff pattern:$0x73625140]  ;;  %v137_v43 = vpack.c.bf16 %v121_v37, %v121_v37 }
  0x26   :  { %671 = vmatpush.bf16.msra.mxu1 %v1400_v14  ;;  %v120_v40 = vld.sshfl [vmem:[#allocation1 + $0x8] sm:$0xff pattern:$0x73625140]  ;;  %v1443_v41 = vld [vmem:[#allocation6 + $0x1b8] sm:$0xff]  ;;  %v135_v44 = vpack.c.bf16 %v119_v38, %v119_v38  ;;  %v138_v45 = vpack.c.bf16 %v122_v39, %v122_v39  ;;  %v1424_v55 = vld [vmem:[#allocation6 + $0x120] sm:$0xff] }
  0x27   :  { %684 = vmatpush.bf16.msra.mxu2 %v1408_v15  ;;  %v1451_v42 = vld [vmem:[#allocation6 + $0x1f8] sm:$0xff]  ;;  %v136_v46 = vpack.c.bf16 %v120_v40, %v120_v40  ;;  %v1426_v47 = vld [vmem:[#allocation6 + $0x130] sm:$0xff]  ;;  %v1433_v52 = vld [vmem:[#allocation6 + $0x168] sm:$0xff] }
  0x28   :  { %697 = vmatpush.bf16.msra.mxu3 %v1416_v16  ;;  %v1434_v48 = vld [vmem:[#allocation6 + $0x170] sm:$0xff]  ;;  %v1441_v53 = vld [vmem:[#allocation6 + $0x1a8] sm:$0xff]  ;;  %v1432_v56 = vld [vmem:[#allocation6 + $0x160] sm:$0xff] }
  0x29   :  { %659 = vmatpush.bf16.msra.mxu0 %v1391_v18  ;;  %v1442_v49 = vld [vmem:[#allocation6 + $0x1b0] sm:$0xff]  ;;  %v1449_v54 = vld [vmem:[#allocation6 + $0x1e8] sm:$0xff]  ;;  %v1440_v57 = vld [vmem:[#allocation6 + $0x1a0] sm:$0xff] }
  0x2a   :  { %672 = vmatpush.bf16.msra.mxu1 %v1399_v19  ;;  %v1450_v50 = vld [vmem:[#allocation6 + $0x1f0] sm:$0xff]  ;;  %v1448_v58 = vld [vmem:[#allocation6 + $0x1e0] sm:$0xff]  ;;  %v1423_v59 = vld [vmem:[#allocation6 + $0x118] sm:$0xff] }
  0x2b   :  { %685 = vmatpush.bf16.msra.mxu2 %v1407_v20  ;;  %v1431_v60 = vld [vmem:[#allocation6 + $0x158] sm:$0xff]  ;;  %v1422_v63 = vld [vmem:[#allocation6 + $0x110] sm:$0xff]  ;;  %v1421_v3 = vld [vmem:[#allocation6 + $0x108] sm:$0xff] }
  0x2c   :  { %698 = vmatpush.bf16.msra.mxu3 %v1415_v21  ;;  %v1439_v61 = vld [vmem:[#allocation6 + $0x198] sm:$0xff]  ;;  %v1430_v0 = vld [vmem:[#allocation6 + $0x150] sm:$0xff]  ;;  %v1429_v4 = vld [vmem:[#allocation6 + $0x148] sm:$0xff]  ;;  %v1629_v21 = vmov 0.0  }
  0x2d   :  { %660 = vmatpush.bf16.msra.mxu0 %v1390_v22  ;;  %v1447_v62 = vld [vmem:[#allocation6 + $0x1d8] sm:$0xff]  ;;  %v1438_v1 = vld [vmem:[#allocation6 + $0x190] sm:$0xff]  ;;  %v1437_v5 = vld [vmem:[#allocation6 + $0x188] sm:$0xff]  ;;  %110 = vst [vmem:[#allocation2] sm:$0x3] %v1629_v21 }
  0x2e   :  { %673 = vmatpush.bf16.msra.mxu1 %v1398_v23  ;;  %v1446_v2 = vld [vmem:[#allocation6 + $0x1d0] sm:$0xff]  ;;  %v1445_v6 = vld [vmem:[#allocation6 + $0x1c8] sm:$0xff]  ;;  %v1420_v7 = vld [vmem:[#allocation6 + $0x100] sm:$0xff] }
  0x2f   :  { %686 = vmatpush.bf16.msra.mxu2 %v1406_v24  ;;  %v1428_v8 = vld [vmem:[#allocation6 + $0x140] sm:$0xff]  ;;  %v124_v12 = vld.sshfl [vmem:[#allocation1 + $0x28] sm:$0xff pattern:$0x73625140]  ;;  %v1452_v21 = vld [vmem:[#allocation11 + $0x4] sm:$0xf] }
  0x30   :  { %699 = vmatpush.bf16.msra.mxu3 %v1414_v25  ;;  %v1436_v9 = vld [vmem:[#allocation6 + $0x180] sm:$0xff]  ;;  %v125_v13 = vld.sshfl [vmem:[#allocation1 + $0x30] sm:$0xff pattern:$0x73625140]  ;;  %v140_v16 = vpack.c.bf16 %v124_v12, %v124_v12 }
  0x31   :  { %661 = vmatpush.bf16.msra.mxu0 %v1389_v26  ;;  %v1444_v10 = vld [vmem:[#allocation6 + $0x1c0] sm:$0xff]  ;;  %v141_v17 = vpack.c.bf16 %v125_v13, %v125_v13  ;;  %v1381_v26 = vld [vmem:[#allocation11 + $0x70] sm:$0xf] }
  0x32   :  { %674 = vmatpush.bf16.msra.mxu1 %v1397_v27  ;;  %v123_v11 = vld.sshfl [vmem:[#allocation1 + $0x20] sm:$0xff pattern:$0x73625140]  ;;  %v126_v14 = vld.sshfl [vmem:[#allocation1 + $0x38] sm:$0xff pattern:$0x73625140] }
  0x33   :  { %687 = vmatpush.bf16.msra.mxu2 %v1405_v28  ;;  %v139_v15 = vpack.c.bf16 %v123_v11, %v123_v11  ;;  %v142_v18 = vpack.c.bf16 %v126_v14, %v126_v14  ;;  %v1467_v27 = vld [vmem:[#allocation11 + $0x74] sm:$0xf0]  ;;  %v1466_v28 = vld [vmem:[#allocation11 + $0x74] sm:$0xf]  ;;  %v1383_v30 = vld [vmem:[#allocation11 + $0x78] sm:$0xf0] }
  0x34   :  { %700 = vmatpush.bf16.msra.mxu3 %v1413_v29  ;;  %v1382_v29 = vor.u32 %v1467_v27, %v1381_v26  ;;  %v1365_v40 = vld [vmem:[#allocation11 + $0x50] sm:$0xf] }
  0x35   :  { %662 = vmatpush.bf16.msra.mxu0 %v1388_v31  ;;  %v1373_v31 = vld [vmem:[#allocation11 + $0x60] sm:$0xf] }
  0x36   :  { %675 = vmatpush.bf16.msra.mxu1 %v1396_v32  ;;  %v1465_v32 = vld [vmem:[#allocation11 + $0x64] sm:$0xf0] }
  0x37   :  { %688 = vmatpush.bf16.msra.mxu2 %v1404_v33  ;;  %v1374_v38 = vor.u32 %v1465_v32, %v1373_v31 }
  0x38   :  { %701 = vmatpush.bf16.msra.mxu3 %v1412_v34  ;;  %663 = vmatmul.bf16.vlgmr.msra.gmra.mxu0 %v135_v44  ;;  %v1386_v34 = vor.u32 %v1466_v28, %v1383_v30 }
  0x39   :  { %707 = vmatpush.bf16.msrb.mxu0 %v1427_v35  ;;  %676 = vmatmul.bf16.vlgmr.msra.gmra.mxu1 %v136_v46  ;;  %v1464_v35 = vld [vmem:[#allocation11 + $0x64] sm:$0xf]  ;;  %v1357_v46 = vld [vmem:[#allocation11 + $0x40] sm:$0xf] }
  0x3a   :  { %720 = vmatpush.bf16.msrb.mxu1 %v1435_v36  ;;  %689 = vmatmul.bf16.vlgmr.msra.gmra.mxu2 %v137_v43  ;;  %v1375_v36 = vld [vmem:[#allocation11 + $0x68] sm:$0xf0]  ;;  %v1367_v43 = vld [vmem:[#allocation11 + $0x58] sm:$0xf0] }
  0x3b   :  { %733 = vmatpush.bf16.msrb.mxu2 %v1443_v41  ;;  %702 = vmatmul.bf16.vlgmr.msra.gmra.mxu3 %v138_v45  ;;  %v1378_v39 = vor.u32 %v1464_v35, %v1375_v36  ;;  %v1463_v41 = vld [vmem:[#allocation11 + $0x54] sm:$0xf0] }
  0x3c   :  { %746 = vmatpush.bf16.msrb.mxu3 %v1451_v42  ;;  %v1462_v42 = vld [vmem:[#allocation11 + $0x54] sm:$0xf]  ;;  %v1366_v44 = vor.u32 %v1463_v41, %v1365_v40 }
  0x3d   :  { %708 = vmatpush.bf16.msrb.mxu0 %v1426_v47  ;;  %v1370_v45 = vor.u32 %v1462_v42, %v1367_v43  ;;  %v1461_v47 = vld [vmem:[#allocation11 + $0x44] sm:$0xf0] }
  0x3e   :  { %721 = vmatpush.bf16.msrb.mxu1 %v1434_v48 }
  0x3f   :  { %734 = vmatpush.bf16.msrb.mxu2 %v1442_v49  ;;  %v1460_v49 = vld [vmem:[#allocation11 + $0x44] sm:$0xf] }
  0x40   :  { %747 = vmatpush.bf16.msrb.mxu3 %v1450_v50  ;;  %v1359_v50 = vld [vmem:[#allocation11 + $0x48] sm:$0xf0] }
  0x41   :  { %709 = vmatpush.bf16.msrb.mxu0 %v1425_v51  ;;  %v1358_v51 = vor.u32 %v1461_v47, %v1357_v46 }
  0x42   :  { %722 = vmatpush.bf16.msrb.mxu1 %v1433_v52  ;;  %v1362_v52 = vor.u32 %v1460_v49, %v1359_v50 }
  0x43   :  { %735 = vmatpush.bf16.msrb.mxu2 %v1441_v53  ;;  %v1349_v53 = vld [vmem:[#allocation11 + $0x30] sm:$0xf] }
  0x44   :  { %748 = vmatpush.bf16.msrb.mxu3 %v1449_v54  ;;  %v1459_v54 = vld [vmem:[#allocation11 + $0x34] sm:$0xf0] }
  0x45   :  { %710 = vmatpush.bf16.msrb.mxu0 %v1424_v55 }
  0x46   :  { %723 = vmatpush.bf16.msrb.mxu1 %v1432_v56  ;;  %v1458_v56 = vld [vmem:[#allocation11 + $0x34] sm:$0xf] }
  0x47   :  { %736 = vmatpush.bf16.msrb.mxu2 %v1440_v57  ;;  %v1351_v57 = vld [vmem:[#allocation11 + $0x38] sm:$0xf0] }
  0x48   :  { %749 = vmatpush.bf16.msrb.mxu3 %v1448_v58  ;;  %v1350_v58 = vor.u32 %v1459_v54, %v1349_v53 }
  0x49   :  { %711 = vmatpush.bf16.msrb.mxu0 %v1423_v59  ;;  %v1354_v59 = vor.u32 %v1458_v56, %v1351_v57 }
  0x4a   :  { %724 = vmatpush.bf16.msrb.mxu1 %v1431_v60  ;;  %v1341_v60 = vld [vmem:[#allocation11 + $0x20] sm:$0xf] }
  0x4b   :  { %737 = vmatpush.bf16.msrb.mxu2 %v1439_v61  ;;  %v1457_v61 = vld [vmem:[#allocation11 + $0x24] sm:$0xf0] }
  0x4c   :  { %750 = vmatpush.bf16.msrb.mxu3 %v1447_v62 }
  0x4d   :  { %712 = vmatpush.bf16.msrb.mxu0 %v1422_v63 }
  0x4e   :  { %725 = vmatpush.bf16.msrb.mxu1 %v1430_v0 }
  0x4f   :  { %738 = vmatpush.bf16.msrb.mxu2 %v1438_v1  ;;  %v1456_v1 = vld [vmem:[#allocation11 + $0x24] sm:$0xf] }
  0x50   :  { %751 = vmatpush.bf16.msrb.mxu3 %v1446_v2  ;;  %v1343_v2 = vld [vmem:[#allocation11 + $0x28] sm:$0xf0] }
  0x51   :  { %713 = vmatpush.bf16.msrb.mxu0 %v1421_v3 }
  0x52   :  { %726 = vmatpush.bf16.msrb.mxu1 %v1429_v4  ;;  %v1342_v4 = vor.u32 %v1457_v61, %v1341_v60  ;;  %v1479_v60 = vld [vmem:[#allocation8] ss:$0 sm:$0xff] }
  0x53   :  { %739 = vmatpush.bf16.msrb.mxu2 %v1437_v5  ;;  %v1346_v5 = vor.u32 %v1456_v1, %v1343_v2 }
  0x54   :  { %752 = vmatpush.bf16.msrb.mxu3 %v1445_v6  ;;  %v1333_v6 = vld [vmem:[#allocation11 + $0x10] sm:$0xf] }
  0x55   :  { %714 = vmatpush.bf16.msrb.mxu0 %v1420_v7  ;;  %v1455_v7 = vld [vmem:[#allocation11 + $0x14] sm:$0xf0] }
  0x56   :  { %727 = vmatpush.bf16.msrb.mxu1 %v1428_v8  ;;  %v1454_v8 = vld [vmem:[#allocation11 + $0x14] sm:$0xf]  ;;  %v1334_v11 = vor.u32 %v1455_v7, %v1333_v6 }
  0x57   :  { %740 = vmatpush.bf16.msrb.mxu2 %v1436_v9  ;;  %v1335_v9 = vld [vmem:[#allocation11 + $0x18] sm:$0xf0] }
  0x58   :  { %753 = vmatpush.bf16.msrb.mxu3 %v1444_v10  ;;  %715 = vmatmul.bf16.vlgmr.msrb.gmra.mxu0 %v139_v15  ;;  %v1338_v14 = vor.u32 %v1454_v8, %v1335_v9  ;;  %v1325_v15 = vld [vmem:[#allocation11] sm:$0xf] }
  0x59   :  { %728 = vmatmul.bf16.vlgmr.msrb.gmra.mxu1 %v140_v16  ;;  %913 = vmatpush.bf16.msra.mxu0 %v1382_v29  ;;  %v1453_v16 = vld [vmem:[#allocation11 + $0x4] sm:$0xf0] }
  0x5a   :  { %741 = vmatmul.bf16.vlgmr.msrb.gmra.mxu2 %v141_v17  ;;  %926 = vmatpush.bf16.msra.mxu1 %v1386_v34  ;;  %v1630_v17 = vmov 2.0  }
  0x5b   :  { %754 = vmatmul.bf16.vlgmr.msrb.gmra.mxu3 %v142_v18  ;;  %1482 = vrcp.f32 %v1630_v17 }
  0x5d   :  { %914 = vmatpush.bf16.msra.mxu0 %v1374_v38 }
  0x5e   :  { %927 = vmatpush.bf16.msra.mxu1 %v1378_v39 }
  0x61   :  { %915 = vmatpush.bf16.msra.mxu0 %v1366_v44  ;;  %v1483_v28 = vpop.eup %1482 }
  0x62   :  { %928 = vmatpush.bf16.msra.mxu1 %v1370_v45  ;;  %v776_v31 = vmul.f32 2.0, %v1483_v28  ;;  %vm780_vm1 = vweird.f32 %v1483_v28 }
  0x64   :  { %v777_v32 = vsub.f32 1.0, %v776_v31 }
  0x65   :  { %916 = vmatpush.bf16.msra.mxu0 %v1358_v51 }
  0x66   :  { %929 = vmatpush.bf16.msra.mxu1 %v1362_v52  ;;  %v778_v36 = vmul.f32 %v1483_v28, %v777_v32 }
  0x68   :  { %v779_v39 = vadd.f32 %v1483_v28, %v778_v36 }
  0x69   :  { %917 = vmatpush.bf16.msra.mxu0 %v1350_v58 }
  0x6a   :  { %930 = vmatpush.bf16.msra.mxu1 %v1354_v59  ;;  %v1700_v42 = vsel %vm780_vm1, %v1483_v28, %v779_v39  ;;  %vm1058_vm1 = vcmask 1024  }
  0x6d   :  { %918 = vmatpush.bf16.msra.mxu0 %v1342_v4 }
  0x6e   :  { %931 = vmatpush.bf16.msra.mxu1 %v1346_v5 }
  0x71   :  { %919 = vmatpush.bf16.msra.mxu0 %v1334_v11 }
  0x72   :  { %932 = vmatpush.bf16.msra.mxu1 %v1338_v14 }
  0xb5   :  { %v664_v19 = vpop.f32.mrf.mxu0 }
  0xb6   :  { %v677_v20 = vpop.f32.mrf.mxu1 }
  0xb7   :  { %v678_v48 = vadd.f32 %v677_v20, %v664_v19 }
  0xbd   :  { %v690_v22 = vpop.f32.mrf.mxu2  ;;  %v666_v24 = vpop.f32.mrf.mxu0 }
  0xbe   :  { %v703_v23 = vpop.f32.mrf.mxu3  ;;  %v679_v25 = vpop.f32.mrf.mxu1  ;;  %v691_v55 = vadd.f32 %v690_v22, %v678_v48  ;;  %v1327_v22 = vld [vmem:[#allocation11 + $0x8] sm:$0xf0] }
  0xbf   :  { %v1326_v25 = vor.u32 %v1453_v16, %v1325_v15  ;;  %v1330_v26 = vor.u32 %v1452_v21, %v1327_v22 }
  0xc0   :  { %v704_v62 = vadd.f32 %v703_v23, %v691_v55  ;;  %v113_v23 = vld [vmem:[#allocation2] sm:$0x3] }
  0xc1   :  { %920 = vmatpush.bf16.msra.mxu0 %v1326_v25  ;;  %933 = vmatpush.bf16.msra.mxu1 %v1330_v26 }
  0xc5   :  { %v692_v33 = vpop.f32.mrf.mxu2 }
  0xc6   :  { %v705_v37 = vpop.f32.mrf.mxu3 }
  0xd5   :  { %v716_v63 = vpop.f32.mrf.mxu0 }
  0xd6   :  { %v729_v0 = vpop.f32.mrf.mxu1  ;;  %v717_v3 = vadd.f32 %v716_v63, %v704_v62 }
  0xd8   :  { %v730_v10 = vadd.f32 %v729_v0, %v717_v3  ;;  %v1480_v0 = vld [vmem:[#allocation9] ss:$0 sm:$0xff] }
  0xdd   :  { %v742_v12 = vpop.f32.mrf.mxu2  ;;  %v718_v19 = vpop.f32.mrf.mxu0 }
  0xde   :  { %v755_v13 = vpop.f32.mrf.mxu3  ;;  %v743_v18 = vadd.f32 %v742_v12, %v730_v10  ;;  %v731_v20 = vpop.f32.mrf.mxu1 }
  0xe0   :  { %v756_v24 = vadd.f32 %v755_v13, %v743_v18 }
  0xe2   :  { %v759_v27 = vadd.f32 %v756_v24, %v113_v23 }
  0xe4   :  { %760 = vst [vmem:[#allocation2] sm:$0x3] %v759_v27 }
  0xe5   :  { %v744_v29 = vpop.f32.mrf.mxu2 }
  0xe6   :  { %v757_v30 = vpop.f32.mrf.mxu3 }
  0xeb   :  { %v764_v33 = vld [vmem:[#allocation2] sm:$0x3] }
  0xec   :  { %v768_v34 = vsel %vm767_vm0, %v764_v33, 0.0 }
  0xed   :  { %v769_v35 = vrot.slane %v768_v34, 4 }
  0xef   :  { %v770_v37 = vadd.f32 %v769_v35, %v768_v34 }
  0xf1   :  { %v771_v38 = vrot.slane %v770_v37, 2 }
  0xf3   :  { %v772_v40 = vadd.f32 %v771_v38, %v770_v37 }
  0xf5   :  { %v773_v41 = vrot.slane %v772_v40, 1 }
  0xf7   :  { %v774_v43 = vadd.f32 %v773_v41, %v772_v40 }
  0xf9   :  { %v782_v44 = vmul.f32 %v1700_v42, %v774_v43 }
  0xfb   :  { %v783_v45 = vsub.f32 %v764_v33, %v782_v44 }
  0xfd   :  { %v784_v46 = vmul.f32 %v783_v45, %v783_v45  ;;  %v796_v63 = vmul.f32 %v1479_v60, %v783_v45 }
  0xff   :  { %v785_v47 = vsel %vm767_vm0, %v784_v46, 0.0 }
 0x100   :  { %v786_v48 = vrot.slane %v785_v47, 4 }
 0x102   :  { %v787_v49 = vadd.f32 %v786_v48, %v785_v47 }
 0x104   :  { %v788_v50 = vrot.slane %v787_v49, 2 }
 0x106   :  { %v789_v51 = vadd.f32 %v788_v50, %v787_v49 }
 0x108   :  { %v790_v52 = vrot.slane %v789_v51, 1 }
 0x10a   :  { %v791_v53 = vadd.f32 %v790_v52, %v789_v51 }
 0x10c   :  { %v792_v54 = vmul.f32 %v791_v53, %v1700_v42 }
 0x10e   :  { %v797_v55 = vadd.f32 1e-05, %v792_v54  ;;  %v939_v54 = vld [vmem:[%s1732_s5] sm:$0x3] }
 0x110   :  { %1484 = vrsqrt.f32 %v797_v55  ;;  %vm804_vm3 = vweird.f32 %v797_v55 }
 0x116   :  { %v1485_v56 = vpop.eup %1484 }
 0x117   :  { %v799_v57 = vmul.f32 %v1485_v56, %v797_v55  ;;  %vm805_vm2 = vweird.f32 %v1485_v56 }
 0x118   :  { %vm806_vm4 = vmor %vm804_vm3, %vm805_vm2 }
 0x119   :  { %v800_v58 = vmul.f32 %v1485_v56, %v799_v57 }
 0x11b   :  { %v801_v59 = vmul.f32 0.5, %v800_v58  ;;  %v978_v58 = vperm.slane %v939_v54, 0 }
 0x11d   :  { %v802_v61 = vsub.f32 1.5, %v801_v59 }
 0x11f   :  { %v803_v62 = vmul.f32 %v1485_v56, %v802_v61  ;;  %v979_v61 = vperm.slane %v939_v54, 1 }
 0x121   :  { %v807_v1 = vsel %vm806_vm4, %v1485_v56, %v803_v62 }
 0x122   :  { %v808_v2 = vmul.f32 %v807_v1, %v796_v63 }
 0x124   :  { %v812_v3 = vadd.f32 %v1480_v0, %v808_v2 }
 0x126   :  { %vm813_vm5 = vcmp.ge.f32.partialorder %v812_v3, 0.0  ;;  %v814_v4 = vmul.f32 0.2, %v812_v3 }
 0x128   :  { %v815_v5 = vsel %vm813_vm5, %v812_v3, %v814_v4 }
 0x129   :  { %v816_v6 = vpack.c.bf16 %v815_v5, %v815_v5 }
 0x12b   :  { %921 = vmatmul.bf16.vlgmr.msra.gmra.mxu0 %v816_v6  ;;  %934 = vmatmul.bf16.vlgmr.msra.gmra.mxu1 %v816_v6 }
 0x1a8   :  { %v922_v7 = vpop.f32.mrf.mxu0  ;;  %v935_v8 = vpop.f32.mrf.mxu1 }
 0x1a9   :  { %v941_v9 = vsel %vm767_vm0, %v922_v7, 0.0  ;;  %v948_v10 = vsel %vm767_vm0, %v935_v8, 0.0 }
 0x1aa   :  { %v942_v11 = vrot.slane %v941_v9, 4  ;;  %v949_v12 = vrot.slane %v948_v10, 4 }
 0x1ac   :  { %v943_v13 = vadd.f32 %v942_v11, %v941_v9  ;;  %v950_v14 = vadd.f32 %v949_v12, %v948_v10 }
 0x1ae   :  { %v944_v15 = vrot.slane %v943_v13, 2  ;;  %v951_v16 = vrot.slane %v950_v14, 2 }
 0x1b0   :  { %v945_v17 = vadd.f32 %v944_v15, %v943_v13  ;;  %v952_v18 = vadd.f32 %v951_v16, %v950_v14  ;;  %v924_v19 = vpop.f32.mrf.mxu0  ;;  %v937_v20 = vpop.f32.mrf.mxu1 }
 0x1b2   :  { %v946_v21 = vrot.slane %v945_v17, 1  ;;  %v953_v22 = vrot.slane %v952_v18, 1 }
 0x1b4   :  { %v947_v23 = vadd.f32 %v946_v21, %v945_v17  ;;  %v954_v24 = vadd.f32 %v953_v22, %v952_v18 }
 0x1b6   :  { %v955_v25 = vmul.f32 %v947_v23, %v1700_v42  ;;  %v956_v26 = vmul.f32 %v954_v24, %v1700_v42  ;;  %v1481_v23 = vld [vmem:[#allocation3] ss:$0 sm:$0xff] }
 0x1b8   :  { %v957_v27 = vsub.f32 %v922_v7, %v955_v25  ;;  %v958_v28 = vsub.f32 %v935_v8, %v956_v26  ;;  %v1021_v8 = vld [vmem:[%s1734_s7] sm:$0x3] }
 0x1b9   :  { %v1023_v12 = vperm.slane %v1021_v8, 0  ;;  %v1024_v14 = vperm.slane %v1021_v8, 1 }
 0x1ba   :  { %v959_v29 = vmul.f32 %v957_v27, %v957_v27  ;;  %v960_v30 = vmul.f32 %v958_v28, %v958_v28  ;;  %v982_v0 = vmul.f32 %v978_v58, %v957_v27  ;;  %v983_v4 = vmul.f32 %v979_v61, %v958_v28 }
 0x1bc   :  { %v961_v31 = vsel %vm767_vm0, %v959_v29, 0.0  ;;  %v968_v32 = vsel %vm767_vm0, %v960_v30, 0.0 }
 0x1bd   :  { %v962_v33 = vrot.slane %v961_v31, 4  ;;  %v969_v34 = vrot.slane %v968_v32, 4 }
 0x1bf   :  { %v963_v35 = vadd.f32 %v962_v33, %v961_v31  ;;  %v970_v36 = vadd.f32 %v969_v34, %v968_v32 }
 0x1c1   :  { %v964_v37 = vrot.slane %v963_v35, 2  ;;  %v971_v38 = vrot.slane %v970_v36, 2 }
 0x1c3   :  { %v965_v39 = vadd.f32 %v964_v37, %v963_v35  ;;  %v972_v40 = vadd.f32 %v971_v38, %v970_v36 }
 0x1c5   :  { %v966_v41 = vrot.slane %v965_v39, 1  ;;  %v973_v43 = vrot.slane %v972_v40, 1 }
 0x1c7   :  { %v967_v44 = vadd.f32 %v966_v41, %v965_v39  ;;  %v974_v45 = vadd.f32 %v973_v43, %v972_v40 }
 0x1c9   :  { %v975_v46 = vmul.f32 %v967_v44, %v1700_v42  ;;  %v976_v47 = vmul.f32 %v974_v45, %v1700_v42  ;;  %v940_v42 = vld [vmem:[%s1733_s6] sm:$0x3] }
 0x1ca   :  { %v1009_v1 = vperm.slane %v940_v42, 0  ;;  %v1010_v5 = vperm.slane %v940_v42, 1 }
 0x1cb   :  { %v984_v48 = vadd.f32 1e-05, %v975_v46  ;;  %v985_v49 = vadd.f32 1e-05, %v976_v47 }
 0x1cd   :  { %1486 = vrsqrt.f32 %v984_v48  ;;  %vm992_vm8 = vweird.f32 %v984_v48  ;;  %vm1002_vm10 = vweird.f32 %v985_v49 }
 0x1ce   :  { %1488 = vrsqrt.f32 %v985_v49 }
 0x1d3   :  { %v1487_v50 = vpop.eup %1486 }
 0x1d4   :  { %v1489_v51 = vpop.eup %1488  ;;  %v987_v52 = vmul.f32 %v1487_v50, %v984_v48  ;;  %vm993_vm6 = vweird.f32 %v1487_v50 }
 0x1d5   :  { %v997_v53 = vmul.f32 %v1489_v51, %v985_v49  ;;  %vm1003_vm7 = vweird.f32 %v1489_v51  ;;  %vm994_vm9 = vmor %vm992_vm8, %vm993_vm6 }
 0x1d6   :  { %v988_v55 = vmul.f32 %v1487_v50, %v987_v52  ;;  %vm1004_vm11 = vmor %vm1002_vm10, %vm1003_vm7 }
 0x1d7   :  { %v998_v56 = vmul.f32 %v1489_v51, %v997_v53 }
 0x1d8   :  { %v989_v57 = vmul.f32 0.5, %v988_v55 }
 0x1d9   :  { %v999_v59 = vmul.f32 0.5, %v998_v56 }
 0x1da   :  { %v990_v60 = vsub.f32 1.5, %v989_v57 }
 0x1db   :  { %v1000_v62 = vsub.f32 1.5, %v999_v59 }
 0x1dc   :  { %v991_v63 = vmul.f32 %v1487_v50, %v990_v60 }
 0x1dd   :  { %v1001_v2 = vmul.f32 %v1489_v51, %v1000_v62 }
 0x1de   :  { %v995_v3 = vsel %vm994_vm9, %v1487_v50, %v991_v63 }
 0x1df   :  { %v1006_v6 = vmul.f32 %v995_v3, %v982_v0  ;;  %v1005_v7 = vsel %vm1004_vm11, %v1489_v51, %v1001_v2 }
 0x1e0   :  { %v1007_v9 = vmul.f32 %v1005_v7, %v983_v4 }
 0x1e1   :  { %v1013_v10 = vadd.f32 %v1009_v1, %v1006_v6 }
 0x1e2   :  { %v1014_v11 = vadd.f32 %v1010_v5, %v1007_v9 }
 0x1e3   :  { %vm1015_vm12 = vcmp.ge.f32.partialorder %v1013_v10, 0.0  ;;  %v1017_v13 = vmul.f32 0.2, %v1013_v10 }
 0x1e4   :  { %vm1016_vm13 = vcmp.ge.f32.partialorder %v1014_v11, 0.0  ;;  %v1018_v15 = vmul.f32 0.2, %v1014_v11 }
 0x1e5   :  { %v1019_v16 = vsel %vm1015_vm12, %v1013_v10, %v1017_v13 }
 0x1e6   :  { %v1020_v17 = vsel %vm1016_vm13, %v1014_v11, %v1018_v15  ;;  %v1027_v18 = vmul.f32 %v1023_v12, %v1019_v16 }
 0x1e7   :  { %v1028_v19 = vmul.f32 %v1024_v14, %v1020_v17 }
 0x1e8   :  { %v1029_v20 = vsel %vm767_vm0, %v1027_v18, 0.0 }
 0x1e9   :  { %v1030_v21 = vsel %vm767_vm0, %v1028_v19, 0.0 }
 0x1ea   :  { %v1031_v22 = vadd.f32 %v1030_v21, %v1029_v20 }
 0x1ec   :  { %1032 = vadd.xlane.f32.xlu0 %v1031_v22 }
 0x25f   :  { %v1033_v24 = vpop.xlane.xlu0 %1032 }
 0x260   :  { %v1038_v25 = vadd.f32 %v1481_v23, %v1033_v24 }
 0x262   :  { %v1387_v26 = vmul.f32 -1.442695, %v1038_v25 }
 0x264   :  { %1490 = vpow2.f32 %v1387_v26 }
 0x26a   :  { %v1491_v27 = vpop.eup %1490 }
 0x26b   :  { %v1042_v28 = vadd.f32 1.0, %v1491_v27 }
 0x26d   :  { %1492 = vrcp.f32 %v1042_v28  ;;  %v1054_v32 = vand.u32 2147483648, %v1042_v28  ;;  %v1052_v34 = vand.u32 2147483647, %v1042_v28  ;;  %vm1048_vm15 = vweird.f32 %v1042_v28 }
 0x26f   :  { %v1055_v36 = vor.u32 1.1754944e-38, %v1054_v32  ;;  %vm1053_vm2 = vcmp.eq.f32.partialorder %v1052_v34, 8.507059e+37 }
 0x273   :  { %v1493_v29 = vpop.eup %1492 }
 0x274   :  { %v1044_v30 = vmul.f32 %v1493_v29, %v1042_v28  ;;  %vm1049_vm14 = vweird.f32 %v1493_v29 }
 0x275   :  { %vm1050_vm0 = vmor %vm1048_vm15, %vm1049_vm14 }
 0x276   :  { %v1045_v31 = vsub.f32 1.0, %v1044_v30 }
 0x278   :  { %v1046_v33 = vmul.f32 %v1493_v29, %v1045_v31 }
 0x27a   :  { %v1047_v35 = vadd.f32 %v1493_v29, %v1046_v33 }
 0x27c   :  { %v1051_v37 = vsel %vm1050_vm0, %v1493_v29, %v1047_v35 }
 0x27d   :  { %v1056_v38 = vsel %vm1053_vm2, %v1055_v36, %v1051_v37 }
 0x27e   :  { %1059 = vst.msk [vmem:[%s1736_s9] sm:$0x3] %vm1058_vm1, %v1056_v38 }
 0x27f   :  { %1064 = vsyncpa [#allocation5], 1 }
 0x280   :  { %1065 = vsyncpa [#allocation7], 1 }
 0x281   :  { %1066 = vsyncpa [#allocation10], 1 }

</bundles_post_ra>
